<compile_context>
chip_gen: v7x
topology: tpu7x:2x2x1
jax: 0.10.0
libtpu: 0.0.40
codegen_flags: <defaults>
</compile_context>

<pallas_src>
import functools

import jax
import jax.numpy as jnp
from jax.experimental import pallas as pl
from jax.experimental.pallas import tpu as pltpu

_LANES = 128


def _poly3_kernel(coef_ref, x_ref, o_ref):
    # coef_ref: SMEM (4,) f32 scalars [a, b, c, d]
    a = coef_ref[0]
    b = coef_ref[1]
    c = coef_ref[2]
    d = coef_ref[3]
    # Horner form: a + x*(b + x*(c + x*d)).  Compute in f32; the kernel is
    # HBM-DMA-bound so the upcast is free (VALU has ample slack).
    # TODO(synk): optional bf16-native Horner on v6e/v7x for bf16 inputs.
    x = x_ref[...].astype(jnp.float32)
    y = a + x * (b + x * (c + x * d))
    o_ref[...] = y.astype(o_ref.dtype)


@functools.lru_cache(maxsize=1)
def _chip_config():
    """Returns (target_block_bytes, vmem_limit_bytes), generation-aware."""
    target = 4 << 20        # ~4 MiB blocks: ~86% of HBM roofline on v5e/v6e
    vmem_limit = 32 << 20   # 4 buffers (double-buffered in+out) x 4 MiB + slack
    try:
        info = pltpu.get_tpu_info()
        cap = getattr(info, "vmem_capacity_bytes", None)
        if cap is not None and cap <= (64 << 20):
            # v7x-like: fast HBM makes the ~0.35us per-grid-step overhead
            # relatively expensive -> bigger blocks.  4 x 8 MiB = 32 MiB of
            # buffers stays well under the 64 MiB physical VMEM.
            target = 8 << 20
            vmem_limit = 48 << 20
    except Exception:
        pass  # conservative defaults are correct on every generation
    return target, vmem_limit


def _choose_tile_rows(rows, itemsize, target_block_bytes, vmem_limit_bytes):
    """Pick (tile_rows, grid_rows) for a [rows, 128] slab."""
    # Sublane packing multiple for this dtype: 8 rows for 32-bit, 16 for
    # 16-bit, 32 for 8-bit -- block boundaries never split a packed group.
    mult = max(8, 32 // max(1, itemsize))
    row_bytes = _LANES * itemsize
    total_bytes = rows * row_bytes
    budget = int(vmem_limit_bytes * 0.9)

    # Small/medium input: single block, zero per-step pipeline overhead,
    # provided the (conservatively double-buffered) in+out buffers fit VMEM.
    if total_bytes < 2 * target_block_bytes and 4 * total_bytes <= budget:
        return rows, 1

    tr = max(1, target_block_bytes // row_bytes)
    if total_bytes >= 2 * target_block_bytes:
        tr = min(tr, -(-rows // 2))
    tr = -(-tr // mult) * mult          # round up to sublane packing multiple
    tr = min(tr, rows)
    grid_rows = -(-rows // tr)

    # Megacore balance (v7x): a small odd block count leaves one TC with an
    # extra block; grow the tile so the grid becomes even (also shaves one
    # grid step on single-TC chips) if the bigger tile still fits VMEM.
    if 3 <= grid_rows <= 8 and grid_rows % 2 == 1:
        tr2 = -(-rows // (grid_rows - 1))
        tr2 = min(-(-tr2 // mult) * mult, rows)
        new_grid = -(-rows // tr2)
        if (new_grid == 1 or new_grid % 2 == 0) and 4 * tr2 * row_bytes <= budget:
            tr, grid_rows = tr2, new_grid
    return tr, grid_rows


def _poly3_jnp(x, coefs, out_dtype):
    """Plain-JAX fallback for tiny / tail pieces (<128 elements)."""
    a, b, c, d = coefs[0], coefs[1], coefs[2], coefs[3]
    xf = x.astype(jnp.float32)
    return (a + xf * (b + xf * (c + xf * d))).astype(out_dtype)


def _poly3_pallas_2d(x2d, coefs, out_dtype, target_block_bytes, vmem_limit_bytes):
    rows = x2d.shape[0]
    itemsize = jnp.dtype(x2d.dtype).itemsize
    tr, grid_rows = _choose_tile_rows(rows, itemsize, target_block_bytes,
                                      vmem_limit_bytes)
    return pl.pallas_call(
        _poly3_kernel,
        out_shape=jax.ShapeDtypeStruct(x2d.shape, out_dtype),
        grid_spec=pltpu.PrefetchScalarGridSpec(
            num_scalar_prefetch=0,
            grid=(grid_rows,),
            in_specs=[
                pl.BlockSpec(memory_space=pltpu.SMEM),          # coefs in SMEM
                pl.BlockSpec((tr, _LANES), lambda i: (i, 0)),   # x tile
            ],
            out_specs=pl.BlockSpec((tr, _LANES), lambda i: (i, 0)),
        ),
        compiler_params=pltpu.CompilerParams(
            dimension_semantics=("parallel",),
            vmem_limit_bytes=vmem_limit_bytes,
        ),
    )(coefs, x2d)


def polynomial3(x, a, b, c, d):
    """Elementwise cubic polynomial in a Pallas TPU kernel.

    x: any shape, floating dtype (integer inputs are not supported: the final
    cast back to the input dtype would silently round).  a,b,c,d: scalars
    (cast to f32 for compute).  Output has the same shape and dtype as x.
    """
    orig_shape = x.shape
    orig_dtype = x.dtype
    n = x.size
    if n == 0:
        return x

    coefs = jnp.stack([jnp.asarray(v, jnp.float32) for v in (a, b, c, d)])
    target_block_bytes, vmem_limit_bytes = _chip_config()

    n_main = (n // _LANES) * _LANES

    if n_main == n:
        # Fast path: lane-aligned size -> free reshape, zero extra copies,
        # HBM traffic is exactly read-N + write-N.
        x2d = jnp.reshape(x, (n // _LANES, _LANES))
        out2d = _poly3_pallas_2d(x2d, coefs, orig_dtype,
                                 target_block_bytes, vmem_limit_bytes)
        return out2d.reshape(orig_shape)

    xf = jnp.reshape(x, (n,))

    if n_main == 0:
        # Tiny (<128 elements): a kernel launch is pure overhead.
        return _poly3_jnp(xf, coefs, orig_dtype).reshape(orig_shape)

    # Unaligned: kernel on the lane-aligned prefix, plain jnp on the <128-elem
    # tail, stitched back together.  Avoids the old full-array pad + post-slice.
    # TODO(synk): a fully copy-free unaligned path would mask the last block
    # inside the kernel using a scalar-prefetched valid length.
    x_main = xf[:n_main].reshape(n_main // _LANES, _LANES)
    y_main = _poly3_pallas_2d(x_main, coefs, orig_dtype,
                              target_block_bytes, vmem_limit_bytes)
    y_tail = _poly3_jnp(xf[n_main:], coefs, orig_dtype)
    return jnp.concatenate([y_main.reshape(-1), y_tail]).reshape(orig_shape)


if __name__ == "__main__":
    key = jax.random.PRNGKey(0)
    kx, ka, kb, kc, kd = jax.random.split(key, 5)

    # Deterministic "randn" parameters (torch.nn.Parameter(torch.randn(())))
    a = jax.random.normal(ka, (), jnp.float32)
    b = jax.random.normal(kb, (), jnp.float32)
    c = jax.random.normal(kc, (), jnp.float32)
    d = jax.random.normal(kd, (), jnp.float32)

    # Main case: lane-aligned input (2*4*16*16 = 2048 elements).
    x = jax.random.normal(kx, (2, 4, 16, 16), jnp.float32)
    y = jax.block_until_ready(polynomial3(x, a, b, c, d))
    y_ref = a + b * x + c * x**2 + d * x**3
    assert y.shape == x.shape and y.dtype == x.dtype
    assert jnp.allclose(y, y_ref, atol=1e-5, rtol=1e-5)

    # Unaligned with an aligned prefix (300 = 2*128 + 44): prefix kernel + jnp tail.
    x2 = jax.random.normal(kx, (3, 100), jnp.float32)
    y2 = jax.block_until_ready(polynomial3(x2, a, b, c, d))
    y2_ref = a + b * x2 + c * x2**2 + d * x2**3
    assert y2.shape == x2.shape and jnp.allclose(y2, y2_ref, atol=1e-5, rtol=1e-5)

    # Tiny unaligned (<128 elements): pure-jnp path.
    x3 = jax.random.normal(kx, (3, 5, 7), jnp.float32)
    y3 = jax.block_until_ready(polynomial3(x3, a, b, c, d))
    y3_ref = a + b * x3 + c * x3**2 + d * x3**3
    assert y3.shape == x3.shape and jnp.allclose(y3, y3_ref, atol=1e-5, rtol=1e-5)

    # bf16 input: exercises dtype-aware sublane rounding; compute stays in f32.
    xb = jax.random.normal(kx, (4, 256), jnp.float32).astype(jnp.bfloat16)
    yb = jax.block_until_ready(polynomial3(xb, a, b, c, d))
    xbf = xb.astype(jnp.float32)
    yb_ref = (a + xbf * (b + xbf * (c + xbf * d))).astype(jnp.bfloat16)
    assert yb.dtype == jnp.bfloat16
    assert jnp.allclose(yb.astype(jnp.float32), yb_ref.astype(jnp.float32),
                        atol=1e-2, rtol=1e-2)

    print("KERNEL_OK")
</pallas_src>

<mosaic_0001>
module attributes {stable_mosaic.version = 11 : i64} {
  func.func @_poly3_kernel(%arg0: i32, %arg1: memref<4xf32, #tpu.memory_space<smem>>, %arg2: memref<16x128xf32, #tpu.memory_space<vmem>>, %arg3: memref<16x128xf32, #tpu.memory_space<vmem>>) attributes {dimension_semantics = [#tpu.dimension_semantics<parallel>], iteration_bounds = array<i64: 1>, scalar_prefetch = 0 : i64, scratch_operands = 0 : i64, tpu.core_type = #tpu.core_type<tc>, window_params = [{transform_indices = @transform_0, window_bounds = array<i64: 4>}, {transform_indices = @transform_1, window_bounds = array<i64: 16, 128>}, {transform_indices = @transform_2, window_bounds = array<i64: 16, 128>}]} {
    %c0 = arith.constant 0 : index
    %0 = memref.load %arg1[%c0] : memref<4xf32, #tpu.memory_space<smem>>
    %c1 = arith.constant 1 : index
    %1 = memref.load %arg1[%c1] : memref<4xf32, #tpu.memory_space<smem>>
    %c2 = arith.constant 2 : index
    %2 = memref.load %arg1[%c2] : memref<4xf32, #tpu.memory_space<smem>>
    %c3 = arith.constant 3 : index
    %3 = memref.load %arg1[%c3] : memref<4xf32, #tpu.memory_space<smem>>
    %c0_0 = arith.constant 0 : index
    %c0_1 = arith.constant 0 : index
    %4 = vector.load %arg2[%c0_0, %c0_1] : memref<16x128xf32, #tpu.memory_space<vmem>>, vector<16x128xf32>
    %5 = vector.broadcast %3 : f32 to vector<16x128xf32>
    %6 = arith.mulf %4, %5 : vector<16x128xf32>
    %7 = vector.broadcast %2 : f32 to vector<16x128xf32>
    %8 = arith.addf %7, %6 : vector<16x128xf32>
    %9 = arith.mulf %4, %8 : vector<16x128xf32>
    %10 = vector.broadcast %1 : f32 to vector<16x128xf32>
    %11 = arith.addf %10, %9 : vector<16x128xf32>
    %12 = arith.mulf %4, %11 : vector<16x128xf32>
    %13 = vector.broadcast %0 : f32 to vector<16x128xf32>
    %14 = arith.addf %13, %12 : vector<16x128xf32>
    %c0_2 = arith.constant 0 : index
    %c0_3 = arith.constant 0 : index
    %15 = vector.load %arg3[%c0_2, %c0_3] : memref<16x128xf32, #tpu.memory_space<vmem>>, vector<16x128xf32>
    tpu.vector_store %arg3[%c0_2, %c0_3], %14 {strides = array<i32>} : memref<16x128xf32, #tpu.memory_space<vmem>>, vector<16x128xf32>,
    return
  }
  func.func @transform_0(%arg0: i32) -> i32 {
    %c0_i32 = arith.constant 0 : i32
    %c0_i32_0 = arith.constant 0 : i32
    return %c0_i32 : i32
  }
  func.func @transform_1(%arg0: i32) -> (i32, i32) {
    %c0_i32 = arith.constant 0 : i32
    %c0_i32_0 = arith.constant 0 : i32
    return %arg0, %c0_i32 : i32, i32
  }
  func.func @transform_2(%arg0: i32) -> (i32, i32) {
    %c0_i32 = arith.constant 0 : i32
    %c0_i32_0 = arith.constant 0 : i32
    return %arg0, %c0_i32 : i32, i32
  }
}

</mosaic_0001>

<bundles_post_ra>
// kernel: tpu_custom_call.1
= control target key start
LH: loop header
LB: loop body
LE: loop exit
PB: predicated region body
PF: predicated region fallthrough
CT: control target
= control target key end

     0   :  { %7 = vsyncpa [#allocation5], 0  ;;  %s209_s0 = inlined_call_operand.hbm [shape: f32[4], index: 0, kind: input, shape index: {}]   ;;  %s210_s1 = inlined_call_operand.hbm [shape: f32[16,128], index: 1, kind: input, shape index: {}]   ;;  %s211_s2 = inlined_call_operand.hbm [shape: f32[16,128], index: 2, kind: output, shape index: {}]  }
   0x1   :  { %8 = vsyncpa [#allocation3], 0 }
   0x2   :  { %9 = vsyncpa [#allocation4], 0  ;;  %s87_s11 = scalar_lea.hbm %s209_s0, 16 }
   0x3   :  { %p88_p0 = scmp.ne.s32.totalorder %s209_s0, %s87_s11  ;;  %p91_p1 = scmp.lt.u32.totalorder %s87_s11, %s209_s0 }
   0x5   :  { %p93_p2 = pnand %p91_p1, %p88_p0 }
   0x7   :  { %96 = shalt.err (!%p93_p2)
}
   0x8   :  { %s147_s16 = smov [#allocation2]   ;;  %s148_s19 = smov [#allocation6]  }
   0x9   :  { %17 = dma.hbm_to_smem %s209_s0, 16, %s147_s16, [#allocation5]  }
   0xa   :  { %s23_s20 = sshll.u32 %s148_s19, 4  ;;  %s97_s23 = scalar_lea.hbm %s210_s1, 256  ;;  %s24_s20 = int_to_ptr.vmem [resolvable:$true] %s23_s20 }
   0xb   :  { %p98_p3 = scmp.ne.s32.totalorder %s210_s1, %s97_s23  ;;  %p101_p4 = scmp.lt.u32.totalorder %s97_s23, %s210_s1 }
   0xd   :  { %p103_p5 = pnand %p101_p4, %p98_p3 }
   0xf   :  { %106 = shalt.err (!%p103_p5)
}
  0x10   :  { %s107_s28 = scalar_lea.vmem %s24_s20, 256  ;;  %p112_p7 = scmp.lt.s32.totalorder %s24_s20, %s24_s20 }
  0x11   :  { %p108_p6 = scmp.ne.s32.totalorder %s24_s20, %s107_s28  ;;  %p113_p8 = scmp.lt.s32.totalorder %s107_s28, %s107_s28 }
  0x13   :  { %p114_p9 = por %p113_p8, %p112_p7 }
  0x15   :  { %p115_p10 = pnand %p114_p9, %p108_p6 }
  0x17   :  { %118 = shalt.err (!%p115_p10)
}
  0x18   :  { %s149_s0 = smov 128   ;;  %s150_s29 = smov 8  }
  0x19   :  { %29 = dma.hbm_to_vmem [thread:$0]  %s210_s1, 256, %s24_s20, [#allocation3], %s149_s0, %s149_s0, %s150_s29  }
  0x1a   :  { %141 = dma.done.wait [#allocation5], 16  }
  0x1b   :  { %142 = vsyncadd [#allocation5], 4294967280 }
  0x1c   :  { %143 = dma.done.wait [#allocation3], 256  }
  0x1d   :  { %144 = vsyncadd [#allocation3], 4294967040 }
  0x1e   :  { %36 = sfence }
  0x1f   :  { %s80_s4 = sld [smem:[#allocation2 + $0x2]]  ;;  %s81_s5 = sld [smem:[#allocation2 + $0x3]]  ;;  %v41_v0 = vld [vmem:[#allocation6] sm:$0xff]  ;;  %v42_v1 = vld [vmem:[#allocation6 + $0x8] sm:$0xff] }
  0x20   :  { %s79_s6 = sld [smem:[#allocation2 + $0x1]]  ;;  %s37_s7 = sld [smem:[#allocation2]] }
  0x21   :  { %s151_s1 = smov [#allocation7]  }
  0x22   :  { %s66_s8 = sshll.u32 %s151_s1, 4  ;;  %s67_s8 = int_to_ptr.vmem [resolvable:$true] %s66_s8 }
  0x23   :  { %s119_s9 = scalar_lea.vmem %s67_s8, 256  ;;  %p124_p12 = scmp.lt.s32.totalorder %s67_s8, %s67_s8 }
  0x24   :  { %p120_p11 = scmp.ne.s32.totalorder %s67_s8, %s119_s9  ;;  %p125_p13 = scmp.lt.s32.totalorder %s119_s9, %s119_s9 }
  0x25   :  { %v43_v2 = vstv %s81_s5  ;;  %v46_v3 = vstv %s80_s4 }
  0x26   :  { %v44_v4 = vmul.f32 %v43_v2, %v41_v0  ;;  %v45_v5 = vmul.f32 %v43_v2, %v42_v1  ;;  %v51_v8 = vstv %s79_s6  ;;  %v56_v13 = vstv %s37_s7  ;;  %p126_p0 = por %p125_p13, %p124_p12 }
  0x28   :  { %v47_v6 = vadd.f32 %v46_v3, %v44_v4  ;;  %v48_v7 = vadd.f32 %v46_v3, %v45_v5  ;;  %p127_p1 = pnand %p126_p0, %p120_p11 }
  0x2a   :  { %v49_v9 = vmul.f32 %v47_v6, %v41_v0  ;;  %v50_v10 = vmul.f32 %v48_v7, %v42_v1 }
  0x2c   :  { %v52_v11 = vadd.f32 %v51_v8, %v49_v9  ;;  %v53_v12 = vadd.f32 %v51_v8, %v50_v10 }
  0x2e   :  { %v54_v14 = vmul.f32 %v52_v11, %v41_v0  ;;  %v55_v15 = vmul.f32 %v53_v12, %v42_v1 }
  0x30   :  { %v57_v16 = vadd.f32 %v56_v13, %v54_v14  ;;  %v58_v17 = vadd.f32 %v56_v13, %v55_v15 }
  0x32   :  { %59 = vst [vmem:[#allocation7] sm:$0xff] %v57_v16  ;;  %60 = vst [vmem:[#allocation7 + $0x8] sm:$0xff] %v58_v17 }
  0x33   :  { %130 = shalt.err (!%p127_p1)
}
  0x34   :  { %s131_s12 = scalar_lea.hbm %s211_s2, 256 }
  0x35   :  { %p132_p2 = scmp.ne.s32.totalorder %s211_s2, %s131_s12  ;;  %p135_p3 = scmp.lt.u32.totalorder %s131_s12, %s211_s2 }
  0x37   :  { %p137_p4 = pnand %p135_p3, %p132_p2 }
  0x39   :  { %140 = shalt.err (!%p137_p4)
}
  0x3a   :  { %72 = dma.vmem_to_hbm [thread:$0]  %s67_s8, 256, %s211_s2, [#allocation4], %s149_s0, %s149_s0, %s150_s29  }
  0x3b   :  { %145 = dma.done.wait [#allocation4], 256  }
  0x3c   :  { %146 = vsyncadd [#allocation4], 4294967040 }
  0x3d   :  { %76 = vsyncpa [#allocation3], 1 }
  0x3e   :  { %77 = vsyncpa [#allocation4], 1 }
  0x3f   :  { %78 = vsyncpa [#allocation5], 1 }

</bundles_post_ra>
